<compile_context>
chip_gen: v6e
topology: v6e:2x2x1
jax: 0.10.0
libtpu: 0.0.40
codegen_flags: <defaults>
</compile_context>

<pallas_src>
import functools
import math

import jax
import jax.numpy as jnp
from jax.experimental import pallas as pl
from jax.experimental.pallas import tpu as pltpu


# ---------------------------------------------------------------------------
# Helpers
# ---------------------------------------------------------------------------

def _row_block(M):
    """Largest convenient row tile that divides M (keeps (8,128) rules valid)."""
    for bm in (1024, 512, 256, 128):
        if M % bm == 0:
            return bm
    return M


_PARALLEL1 = pltpu.CompilerParams(dimension_semantics=("parallel",))


# ---------------------------------------------------------------------------
# Pallas kernels
# ---------------------------------------------------------------------------

def _matmul_bias_kernel(a_ref, b_ref, bias_ref, o_ref, *, relu):
    y = jnp.dot(a_ref[...], b_ref[...], preferred_element_type=jnp.float32)
    y = y + bias_ref[...]
    if relu:
        y = jnp.maximum(y, 0.0)
    o_ref[...] = y


def pallas_linear(x2d, w, b, relu=False):
    """x2d: (M, K), w: (K, N), b: (N,) -> (M, N), bf16 operands, f32 accumulate."""
    M, K = x2d.shape
    N = w.shape[1]
    bm = _row_block(M)
    kern = functools.partial(_matmul_bias_kernel, relu=relu)
    return pl.pallas_call(
        kern,
        out_shape=jax.ShapeDtypeStruct((M, N), jnp.float32),
        grid=(M // bm,),
        in_specs=[pl.BlockSpec((bm, K), lambda i: (i, 0)),
                  pl.BlockSpec((K, N), lambda i: (0, 0)),
                  pl.BlockSpec((1, N), lambda i: (0, 0))],
        out_specs=pl.BlockSpec((bm, N), lambda i: (i, 0)),
        compiler_params=_PARALLEL1,
    )(x2d.astype(jnp.bfloat16), w.astype(jnp.bfloat16),
      b.reshape(1, N).astype(jnp.float32))


def _make_ln_kernel(has_res, has_mask, relu):
    """LayerNorm with optional fused residual add, non-pad mask mul, ReLU."""
    def kern(*refs):
        idx = 0
        x = refs[idx][...]; idx += 1
        if has_res:
            x = x + refs[idx][...]; idx += 1
        g = refs[idx][...]; idx += 1
        bb = refs[idx][...]; idx += 1
        m = None
        if has_mask:
            m = refs[idx][...]; idx += 1
        o_ref = refs[idx]
        mu = jnp.mean(x, axis=-1, keepdims=True)
        var = jnp.mean(jnp.square(x - mu), axis=-1, keepdims=True)
        y = (x - mu) * jax.lax.rsqrt(var + 1e-5)       # torch LayerNorm eps default
        y = y * g + bb
        if relu:
            y = jnp.maximum(y, 0.0)
        if has_mask:
            y = y * m
        o_ref[...] = y
    return kern


def pallas_layernorm(x2d, g, b, residual=None, mask=None, relu=False):
    """Fused (x [+res]) -> LN -> [ReLU] -> [*mask].  x2d: (M, D); mask: (M,)."""
    M, D = x2d.shape
    bm = _row_block(M)
    args = [x2d.astype(jnp.float32)]
    in_specs = [pl.BlockSpec((bm, D), lambda i: (i, 0))]
    if residual is not None:
        args.append(residual.astype(jnp.float32))
        in_specs.append(pl.BlockSpec((bm, D), lambda i: (i, 0)))
    args.append(g.reshape(1, D).astype(jnp.float32))
    args.append(b.reshape(1, D).astype(jnp.float32))
    in_specs.append(pl.BlockSpec((1, D), lambda i: (0, 0)))
    in_specs.append(pl.BlockSpec((1, D), lambda i: (0, 0)))
    if mask is not None:
        args.append(mask.reshape(M, 1).astype(jnp.float32))
        in_specs.append(pl.BlockSpec((bm, 1), lambda i: (i, 0)))
    kern = _make_ln_kernel(residual is not None, mask is not None, relu)
    return pl.pallas_call(
        kern,
        out_shape=jax.ShapeDtypeStruct((M, D), jnp.float32),
        grid=(M // bm,),
        in_specs=in_specs,
        out_specs=pl.BlockSpec((bm, D), lambda i: (i, 0)),
        compiler_params=_PARALLEL1,
    )(*args)


def _mha_kernel(qkv_ref, kp_ref, o_ref, *, n_head, scale):
    """Fused multi-head self-attention for one batch element (all heads)."""
    x = qkv_ref[0]                      # (T, 3D) bf16
    kp = kp_ref[0]                      # (1, T) f32, 1.0 where key is padding
    D = x.shape[-1] // 3
    dk = D // n_head
    neg = jnp.float32(-1e9)
    outs = []
    for h in range(n_head):
        q = x[:, h * dk:(h + 1) * dk]
        k = x[:, D + h * dk:D + (h + 1) * dk]
        v = x[:, 2 * D + h * dk:2 * D + (h + 1) * dk]
        s = jnp.dot(q, k.T, preferred_element_type=jnp.float32) * scale
        s = jnp.where(kp > 0.5, neg, s)            # key-padding mask built in-kernel
        s = s - jnp.max(s, axis=-1, keepdims=True)
        e = jnp.exp(s)
        inv = pl.reciprocal(jnp.sum(e, axis=-1, keepdims=True), approx=True)
        p = e * inv
        outs.append(jnp.dot(p.astype(jnp.bfloat16), v,
                            preferred_element_type=jnp.float32))
    o_ref[0] = jnp.concatenate(outs, axis=-1)


def pallas_attention(qkv, key_pad, n_head, scale):
    """qkv: (B, T, 3D); key_pad: (B, T) float (1.0 = padded key) -> (B, T, D)."""
    B, T, D3 = qkv.shape
    D = D3 // 3
    kern = functools.partial(_mha_kernel, n_head=n_head, scale=scale)
    return pl.pallas_call(
        kern,
        out_shape=jax.ShapeDtypeStruct((B, T, D), jnp.float32),
        grid=(B,),
        in_specs=[pl.BlockSpec((1, T, D3), lambda i: (i, 0, 0)),
                  pl.BlockSpec((1, 1, T), lambda i: (i, 0, 0))],
        out_specs=pl.BlockSpec((1, T, D), lambda i: (i, 0, 0)),
        compiler_params=_PARALLEL1,
    )(qkv.astype(jnp.bfloat16), key_pad.reshape(B, 1, T).astype(jnp.float32))


def _conv1d_kernel(x_ref, w_ref, b_ref, o_ref, *, K, Tout, relu):
    """1-D conv as K accumulated shifted matmuls (no im2col materialisation)."""
    x = x_ref[0]                                    # (Tp, Cin) bf16
    acc = jnp.dot(x[0:Tout, :], w_ref[0], preferred_element_type=jnp.float32)
    for k in range(1, K):
        acc = acc + jnp.dot(x[k:k + Tout, :], w_ref[k],
                            preferred_element_type=jnp.float32)
    y = acc + b_ref[...]
    if relu:
        y = jnp.maximum(y, 0.0)
    o_ref[0] = y


def conv1d(x, w, b, pad, relu=False):
    """x: (B, T, C_in) channels-last; w: (K, C_in, C_out)."""
    B, T, C = x.shape
    K, _, Cout = w.shape
    if K == 1:                                       # pointwise conv == linear
        return linear3d(x, w[0], b, relu)
    Tout = T + 2 * pad - K + 1
    Tp = T + 2 * pad
    xp = jnp.pad(x, ((0, 0), (pad, pad), (0, 0)))
    kern = functools.partial(_conv1d_kernel, K=K, Tout=Tout, relu=relu)
    return pl.pallas_call(
        kern,
        out_shape=jax.ShapeDtypeStruct((B, Tout, Cout), jnp.float32),
        grid=(B,),
        in_specs=[pl.BlockSpec((1, Tp, C), lambda i: (i, 0, 0)),
                  pl.BlockSpec((K, C, Cout), lambda i: (0, 0, 0)),
                  pl.BlockSpec((1, Cout), lambda i: (0, 0))],
        out_specs=pl.BlockSpec((1, Tout, Cout), lambda i: (i, 0, 0)),
        compiler_params=_PARALLEL1,
    )(xp.astype(jnp.bfloat16), w.astype(jnp.bfloat16),
      b.reshape(1, Cout).astype(jnp.float32))


# ---------------------------------------------------------------------------
# 3-D glue
# ---------------------------------------------------------------------------

def linear3d(x, w, b, relu=False):
    B, T, D = x.shape
    return pallas_linear(x.reshape(B * T, D), w, b, relu).reshape(B, T, -1)


def layernorm3d(x, g, b, residual=None, mask=None, relu=False):
    B, T, D = x.shape
    r2 = residual.reshape(B * T, D) if residual is not None else None
    m2 = mask.reshape(B * T) if mask is not None else None
    return pallas_layernorm(x.reshape(B * T, D), g, b, r2, m2, relu).reshape(B, T, D)


# ---------------------------------------------------------------------------
# FastSpeech building blocks
# ---------------------------------------------------------------------------

def fft_block(p, x, non_pad, key_pad, n_head, conv_pads):
    """Multi-head self attention + conv position-wise FFN (post-LayerNorm)."""
    B, T, D = x.shape
    dk = D // n_head

    residual = x
    qkv = linear3d(x, p['wqkv'], p['bqkv'])                       # fused Q|K|V
    attn = pallas_attention(qkv, key_pad, n_head, 1.0 / math.sqrt(dk))
    o = linear3d(attn, p['wo'], p['bo'])
    x = layernorm3d(o, p['ln1_g'], p['ln1_b'], residual=residual, mask=non_pad)

    residual = x
    h = conv1d(x, p['w1'], p['b1'], pad=conv_pads[0], relu=True)  # ReLU fused
    h = conv1d(h, p['w2'], p['b2'], pad=conv_pads[1])             # K=1 -> linear
    x = layernorm3d(h, p['ln2_g'], p['ln2_b'], residual=residual, mask=non_pad)
    return x


def predictor(p, x):
    """Duration/pitch/energy predictor: Conv->LN->ReLU x2 -> Linear -> ReLU -> (B,T)."""
    pad1 = (p['w1'].shape[0] - 1) // 2
    pad2 = (p['w2'].shape[0] - 1) // 2
    h = conv1d(x, p['w1'], p['b1'], pad=pad1)
    h = layernorm3d(h, p['ln1_g'], p['ln1_b'], relu=True)         # LN+ReLU fused
    h = conv1d(h, p['w2'], p['b2'], pad=pad2)
    h = layernorm3d(h, p['ln2_g'], p['ln2_b'], relu=True)
    out = linear3d(h, p['wl'], p['bl'], relu=True)
    return out[..., 0]


def length_regulate(x, durations, mel_max_length):
    """Expand encoder frames by integer target durations, pad to mel_max_length."""
    B, Ts, D = x.shape
    cum = jnp.cumsum(durations.astype(jnp.int32), axis=1)         # (B, Ts)
    total = cum[:, -1]                                            # (B,)
    t = jnp.arange(mel_max_length, dtype=jnp.int32)
    idx = jax.vmap(lambda c: jnp.searchsorted(c, t, side='right'))(cum)  # (B, Tm)
    valid = (t[None, :] < total[:, None]).astype(x.dtype)
    idx = jnp.clip(idx, 0, Ts - 1)
    out = jnp.take_along_axis(x, idx[..., None], axis=1)          # (B, Tm, D)
    return out * valid[..., None]


def fastspeech_forward(params, cfg, src_seq, src_pos, mel_pos, mel_max_length,
                       length_target, pitch_target, energy_target):
    PAD = cfg['PAD']
    H = cfg['encoder_head']
    conv_pads = cfg['fft_conv1d_padding']
    B, Ts = src_seq.shape
    Tm = mel_pos.shape[1]

    # ---------------- Encoder ----------------
    non_pad = (src_seq != PAD).astype(jnp.float32)                # (B, Ts)
    key_pad = (src_seq == PAD).astype(jnp.float32)                # (B, Ts)
    x = (jnp.take(params['word_emb'], src_seq, axis=0)
         + jnp.take(params['pos_table'], src_pos, axis=0))
    for lp in params['enc_layers']:
        x = fft_block(lp, x, non_pad, key_pad, H, conv_pads)

    # ---------------- Length regulator (training path: target durations) ----
    dur_pred = predictor(params['dur_pred'], x)                   # (B, Ts)
    out = length_regulate(x, length_target, mel_max_length)       # (B, Tm, D)

    # ---------------- Pitch / energy ----------------
    pitch_pred = predictor(params['pitch_pred'], out)             # (B, Tm)
    pitch_idx = jnp.searchsorted(params['pitch_bins'], pitch_target, side='left')
    pitch_emb = jnp.take(params['pitch_emb'], pitch_idx, axis=0)
    energy_pred = predictor(params['energy_pred'], out)
    energy_idx = jnp.searchsorted(params['energy_bins'], energy_target, side='left')
    energy_emb = jnp.take(params['energy_emb'], energy_idx, axis=0)
    out = out + pitch_emb + energy_emb

    # ---------------- Decoder ----------------
    dnon_pad = (mel_pos != PAD).astype(jnp.float32)
    dkey_pad = (mel_pos == PAD).astype(jnp.float32)
    y = out + jnp.take(params['pos_table'], mel_pos, axis=0)
    for lp in params['dec_layers']:
        y = fft_block(lp, y, dnon_pad, dkey_pad, H, conv_pads)

    # mask_tensor: zero frames beyond per-batch mel length
    lengths = jnp.max(mel_pos, axis=-1)
    keep = (jnp.arange(mel_max_length)[None, :] < lengths[:, None]).astype(jnp.float32)
    y = y * keep[..., None]

    mel = linear3d(y, params['mel_w'], params['mel_b'])
    return mel, dur_pred, pitch_pred, energy_pred


# ---------------------------------------------------------------------------
# Deterministic parameter initialisation (synthetic; shapes follow __init__)
# ---------------------------------------------------------------------------

def sinusoid_table(n_position, d):
    pos = jnp.arange(n_position, dtype=jnp.float32)[:, None]
    i = jnp.arange(d)
    div = jnp.power(10000.0, (2 * (i // 2)).astype(jnp.float32) / d)
    angle = pos / div[None, :]
    table = jnp.where((i % 2 == 0)[None, :], jnp.sin(angle), jnp.cos(angle))
    return table.at[0].set(0.0)   # padding_idx = 0


def _dense(key, fan_in, fan_out):
    return 0.02 * jax.random.normal(key, (fan_in, fan_out), jnp.float32)


def init_fft_layer(key, d_model, d_inner, kernel):
    ks = jax.random.split(key, 6)
    k1, k2 = kernel
    wq = _dense(ks[0], d_model, d_model)
    wk = _dense(ks[1], d_model, d_model)
    wv = _dense(ks[2], d_model, d_model)
    return dict(
        wqkv=jnp.concatenate([wq, wk, wv], axis=1),               # fused (D, 3D)
        bqkv=jnp.zeros((3 * d_model,), jnp.float32),
        wo=_dense(ks[3], d_model, d_model), bo=jnp.zeros((d_model,), jnp.float32),
        ln1_g=jnp.ones((d_model,), jnp.float32), ln1_b=jnp.zeros((d_model,), jnp.float32),
        w1=0.02 * jax.random.normal(ks[4], (k1, d_model, d_inner), jnp.float32),
        b1=jnp.zeros((d_inner,), jnp.float32),
        w2=0.02 * jax.random.normal(ks[5], (k2, d_inner, d_model), jnp.float32),
        b2=jnp.zeros((d_model,), jnp.float32),
        ln2_g=jnp.ones((d_model,), jnp.float32), ln2_b=jnp.zeros((d_model,), jnp.float32),
    )


def init_predictor(key, d_model, fsize, kernel):
    ks = jax.random.split(key, 3)
    return dict(
        w1=0.02 * jax.random.normal(ks[0], (kernel, d_model, fsize), jnp.float32),
        b1=jnp.zeros((fsize,), jnp.float32),
        ln1_g=jnp.ones((fsize,), jnp.float32), ln1_b=jnp.zeros((fsize,), jnp.float32),
        w2=0.02 * jax.random.normal(ks[1], (kernel, fsize, fsize), jnp.float32),
        b2=jnp.zeros((fsize,), jnp.float32),
        ln2_g=jnp.ones((fsize,), jnp.float32), ln2_b=jnp.zeros((fsize,), jnp.float32),
        wl=_dense(ks[2], fsize, 1), bl=jnp.zeros((1,), jnp.float32),
    )


def init_fastspeech(key, cfg):
    D = cfg['encoder_dim']
    ks = jax.random.split(key, 10)
    n_position = cfg['max_seq_len'] + 1
    word_emb = 0.02 * jax.random.normal(ks[0], (cfg['vocab_size'], D), jnp.float32)
    word_emb = word_emb.at[cfg['PAD']].set(0.0)
    enc_keys = jax.random.split(ks[1], cfg['encoder_n_layer'])
    dec_keys = jax.random.split(ks[2], cfg['decoder_n_layer'])
    F = cfg['duration_predictor_filter_size']
    kp = cfg['duration_predictor_kernel_size']
    return dict(
        word_emb=word_emb,
        pos_table=sinusoid_table(n_position, D),
        enc_layers=[init_fft_layer(k, D, cfg['encoder_conv1d_filter_size'],
                                   cfg['fft_conv1d_kernel']) for k in enc_keys],
        dec_layers=[init_fft_layer(k, D, cfg['encoder_conv1d_filter_size'],
                                   cfg['fft_conv1d_kernel']) for k in dec_keys],
        dur_pred=init_predictor(ks[3], D, F, kp),
        pitch_pred=init_predictor(ks[4], D, F, kp),
        energy_pred=init_predictor(ks[5], D, F, kp),
        pitch_emb=0.02 * jax.random.normal(ks[6], (cfg['n_bins'], D), jnp.float32),
        energy_emb=0.02 * jax.random.normal(ks[7], (cfg['n_bins'], D), jnp.float32),
        pitch_bins=jnp.linspace(cfg['pitch_stat'][0], cfg['pitch_stat'][1], cfg['n_bins'] - 1),
        energy_bins=jnp.linspace(cfg['energy_stat'][0], cfg['energy_stat'][1], cfg['n_bins'] - 1),
        mel_w=_dense(ks[8], D, cfg['num_mels']),
        mel_b=jnp.zeros((cfg['num_mels'],), jnp.float32),
    )


# ---------------------------------------------------------------------------
if __name__ == "__main__":
    cfg = dict(max_seq_len=32, encoder_n_layer=2, decoder_n_layer=2, vocab_size=40,
               encoder_dim=32, PAD=0, encoder_conv1d_filter_size=64, encoder_head=2,
               fft_conv1d_kernel=(9, 1), fft_conv1d_padding=(4, 0),
               duration_predictor_filter_size=32, duration_predictor_kernel_size=3,
               num_mels=16, pitch_stat=(0.0, 5.0), energy_stat=(0.0, 5.0), n_bins=32)

    key = jax.random.PRNGKey(0)
    pkey, dkey = jax.random.split(key)
    params = init_fastspeech(pkey, cfg)

    B, Ts, Tm = 2, 8, 24
    ks = jax.random.split(dkey, 4)
    src_seq = jax.random.randint(ks[0], (B, Ts), 1, cfg['vocab_size'])
    src_seq = src_seq.at[1, 6:].set(cfg['PAD'])                 # pad tail of sequence 1
    src_pos = jnp.where(src_seq != cfg['PAD'], jnp.arange(1, Ts + 1)[None, :], 0)
    length_target = jax.random.randint(ks[1], (B, Ts), 1, 4)
    length_target = jnp.where(src_seq != cfg['PAD'], length_target, 0)
    mel_len = jnp.sum(length_target, axis=1)                    # per-batch mel lengths (<= Tm)
    mel_pos = jnp.where(jnp.arange(1, Tm + 1)[None, :] <= mel_len[:, None],
                        jnp.arange(1, Tm + 1)[None, :], 0)
    pitch_target = jax.random.uniform(ks[2], (B, Tm), minval=0.0, maxval=5.0)
    energy_target = jax.random.uniform(ks[3], (B, Tm), minval=0.0, maxval=5.0)

    outs = fastspeech_forward(params, cfg, src_seq, src_pos, mel_pos, Tm,
                              length_target, pitch_target, energy_target)
    outs = jax.block_until_ready(outs)
    mel, dur_pred, pitch_pred, energy_pred = outs
    assert mel.shape == (B, Tm, cfg['num_mels'])
    assert dur_pred.shape == (B, Ts)
    assert pitch_pred.shape == (B, Tm) and energy_pred.shape == (B, Tm)
    assert all(bool(jnp.all(jnp.isfinite(o))) for o in outs)
    print("KERNEL_OK")
</pallas_src>

<mosaic_0001>
module attributes {stable_mosaic.version = 11 : i64} {
  func.func @_matmul_bias_kernel(%arg0: i32, %arg1: memref<16x32xbf16, #tpu.memory_space<vmem>>, %arg2: memref<32x96xbf16, #tpu.memory_space<vmem>>, %arg3: memref<1x96xf32, #tpu.memory_space<vmem>>, %arg4: memref<16x96xf32, #tpu.memory_space<vmem>>) attributes {dimension_semantics = [#tpu.dimension_semantics<parallel>], iteration_bounds = array<i64: 1>, scalar_prefetch = 0 : i64, scratch_operands = 0 : i64, tpu.core_type = #tpu.core_type<tc>, window_params = [{transform_indices = @transform_0, window_bounds = array<i64: 16, 32>}, {pipeline_mode = #tpu.pipeline_mode<synchronous>, transform_indices = @transform_1, window_bounds = array<i64: 32, 96>}, {pipeline_mode = #tpu.pipeline_mode<synchronous>, transform_indices = @transform_2, window_bounds = array<i64: 1, 96>}, {transform_indices = @transform_3, window_bounds = array<i64: 16, 96>}]} {
    %c0 = arith.constant 0 : index
    %c0_0 = arith.constant 0 : index
    %0 = vector.load %arg1[%c0, %c0_0] : memref<16x32xbf16, #tpu.memory_space<vmem>>, vector<16x32xbf16>
    %c0_1 = arith.constant 0 : index
    %c0_2 = arith.constant 0 : index
    %1 = vector.load %arg2[%c0_1, %c0_2] : memref<32x96xbf16, #tpu.memory_space<vmem>>, vector<32x96xbf16>
    %cst = arith.constant dense<0.000000e+00> : vector<16x96xf32>
    %2 = tpu.matmul %0, %1, %cst {dimension_numbers = #tpu.dot_dimension_numbers<[1], [0], [0], [1], [0, 0, 1, 1], [], []>} : vector<16x32xbf16>, vector<32x96xbf16>, vector<16x96xf32> -> vector<16x96xf32>
    %c0_3 = arith.constant 0 : index
    %c0_4 = arith.constant 0 : index
    %3 = vector.load %arg3[%c0_3, %c0_4] : memref<1x96xf32, #tpu.memory_space<vmem>>, vector<1x96xf32>
    %4 = vector.broadcast %3 : vector<1x96xf32> to vector<16x96xf32>
    %5 = arith.addf %2, %4 : vector<16x96xf32>
    %c0_5 = arith.constant 0 : index
    %c0_6 = arith.constant 0 : index
    %6 = vector.load %arg4[%c0_5, %c0_6] : memref<16x96xf32, #tpu.memory_space<vmem>>, vector<16x96xf32>
    tpu.vector_store %arg4[%c0_5, %c0_6], %5 {strides = array<i32>} : memref<16x96xf32, #tpu.memory_space<vmem>>, vector<16x96xf32>,
    return
  }
  func.func @transform_0(%arg0: i32) -> (i32, i32) {
    %c0_i32 = arith.constant 0 : i32
    %c0_i32_0 = arith.constant 0 : i32
    return %arg0, %c0_i32 : i32, i32
  }
  func.func @transform_1(%arg0: i32) -> (i32, i32) {
    %c0_i32 = arith.constant 0 : i32
    %c0_i32_0 = arith.constant 0 : i32
    %c0_i32_1 = arith.constant 0 : i32
    return %c0_i32, %c0_i32_0 : i32, i32
  }
  func.func @transform_2(%arg0: i32) -> (i32, i32) {
    %c0_i32 = arith.constant 0 : i32
    %c0_i32_0 = arith.constant 0 : i32
    %c0_i32_1 = arith.constant 0 : i32
    return %c0_i32, %c0_i32_0 : i32, i32
  }
  func.func @transform_3(%arg0: i32) -> (i32, i32) {
    %c0_i32 = arith.constant 0 : i32
    %c0_i32_0 = arith.constant 0 : i32
    return %arg0, %c0_i32 : i32, i32
  }
}

</mosaic_0001>

<bundles_post_ra>
// kernel: tpu_custom_call.1
= control target key start
LH: loop header
LB: loop body
LE: loop exit
PB: predicated region body
PF: predicated region fallthrough
CT: control target
= control target key end

     0   :  { %8 = vsyncpa [#allocation3], 0  ;;  %s275_s0 = inlined_call_operand.hbm [shape: bf16[16,32], index: 0, kind: input, shape index: {}]   ;;  %s276_s1 = inlined_call_operand.hbm [shape: bf16[32,96], index: 1, kind: input, shape index: {}]   ;;  %s277_s2 = inlined_call_operand.vmem [shape: f32[1,96], index: 2, kind: input, shape index: {}]   ;;  %s278_s3 = inlined_call_operand.hbm [shape: f32[16,96], index: 3, kind: output, shape index: {}]  }
   0x1   :  { %9 = vsyncpa [#allocation6], 0 }
   0x2   :  { %10 = vsyncpa [#allocation4], 0  ;;  %s234_s12 = smov [#allocation2]  }
   0x3   :  { %s16_s13 = sshll.u32 %s234_s12, 4  ;;  %s17_s13 = int_to_ptr.vmem [resolvable:$true] %s16_s13 }
   0x4   :  { %s176_s14 = scalar_lea.vmem %s17_s13, 128  ;;  %p181_p1 = scmp.lt.s32.totalorder %s17_s13, %s17_s13 }
   0x5   :  { %p177_p0 = scmp.ne.s32.totalorder %s17_s13, %s176_s14  ;;  %p182_p2 = scmp.lt.s32.totalorder %s176_s14, %s176_s14 }
   0x7   :  { %p183_p3 = por %p182_p2, %p181_p1 }
   0x9   :  { %p184_p4 = pnand %p183_p3, %p177_p0 }
   0xb   :  { %187 = shalt.err (!%p184_p4)
}
   0xc   :  { %s235_s15 = smov 64   ;;  %s236_s16 = smov 4  }
   0xd   :  { %22 = dma.hbm_to_vmem [thread:$0]  %s275_s0, 128, %s17_s13, [#allocation3], %s235_s15, %s235_s15, %s236_s16  }
   0xe   :  { %s237_s19 = smov [#allocation5]  }
   0xf   :  { %s28_s20 = sshll.u32 %s237_s19, 4  ;;  %s29_s20 = int_to_ptr.vmem [resolvable:$true] %s28_s20 }
  0x10   :  { %s196_s21 = scalar_lea.vmem %s29_s20, 256  ;;  %p201_p6 = scmp.lt.s32.totalorder %s29_s20, %s29_s20 }
  0x11   :  { %p197_p5 = scmp.ne.s32.totalorder %s29_s20, %s196_s21  ;;  %p202_p7 = scmp.lt.s32.totalorder %s196_s21, %s196_s21 }
  0x13   :  { %p203_p8 = por %p202_p7, %p201_p6 }
  0x15   :  { %p204_p9 = pnand %p203_p8, %p197_p5 }
  0x17   :  { %207 = shalt.err (!%p204_p9)
}
  0x18   :  { %34 = dma.hbm_to_vmem [thread:$0]  %s276_s1, 256, %s29_s20, [#allocation6], %s235_s15, %s235_s15, %s236_s16  }
  0x19   :  { %228 = dma.done.wait [#allocation3], 128  }
  0x1a   :  { %229 = vsyncadd [#allocation3], 4294967168 }
  0x1b   :  { %230 = dma.done.wait [#allocation6], 256  }
  0x1c   :  { %231 = vsyncadd [#allocation6], 4294967040  ;;  %v238_v0 = vmov 0.0   ;;  %vm239_vm0 = vmmov 0   ;;  %v165_v1 = vld [vmem:[#allocation5 + $0x8] sm:$0xff]   ;;  %v166_v2 = vld [vmem:[#allocation5] sm:$0xff]  }
  0x1d   :  { %148 = vmatprep.subr.bf16.mxu0 %v238_v0  ;;  %152 = vmatprep.mubr.msk.bf16.mxu0 %vm239_vm0, %v238_v0  ;;  %v167_v3 = vld [vmem:[#allocation2] sm:$0xff]   ;;  %vm74_vm1 = vcmask 261120   ;;  %vm119_vm2 = vcmask 785408   ;;  %s240_s1 = smov [#allocation7]  }
  0x1e   :  { %149 = vmatpush3.bf16.msra.mxu0 %v165_v1  ;;  %v140_v4 = vld [vmem:[%s277_s2] ss:$0 sm:$0xff]  ;;  %s127_s25 = sshll.u32 %s240_s1, 4  ;;  %s128_s25 = int_to_ptr.vmem [resolvable:$true] %s127_s25 }
  0x1f   :  { %150 = vmatprep.subr.bf16.mxu0 %v238_v0  ;;  %s208_s26 = scalar_lea.vmem %s128_s25, 256  ;;  %p213_p11 = scmp.lt.s32.totalorder %s128_s25, %s128_s25 }
  0x20   :  { %p209_p10 = scmp.ne.s32.totalorder %s128_s25, %s208_s26  ;;  %p214_p12 = scmp.lt.s32.totalorder %s208_s26, %s208_s26 }
  0x22   :  { %151 = vmatpush3.bf16.msra.mxu0 %v166_v2  ;;  %p215_p13 = por %p214_p12, %p213_p11 }
  0x24   :  { %p216_p0 = pnand %p215_p13, %p209_p10 }
  0x25   :  { %153 = vmatmul.mubr.msk.bf16.vlgmr.msra.gmra.mxu0 %vm74_vm1, %v167_v3 }
  0xe5   :  { %v112_v5 = vpop.f32.mrf.mxu0 }
  0xe6   :  { %v113_v6 = vadd.f32 %v140_v4, %v112_v5 }
  0xe7   :  { %v154_v7 = vpop.f32.mrf.mxu0 }
  0xe8   :  { %120 = vst.msk [vmem:[#allocation7] sm:$0xff] %vm119_vm2, %v113_v6 }
  0xe9   :  { %v115_v8 = vpop.f32.mrf.mxu0 }
  0xea   :  { %v116_v9 = vadd.f32 %v140_v4, %v115_v8 }
  0xeb   :  { %v155_v10 = vpop.f32.mrf.mxu0 }
  0xec   :  { %121 = vst.msk [vmem:[#allocation7 + $0x8] sm:$0xff] %vm119_vm2, %v116_v9 }
  0xed   :  { %219 = shalt.err (!%p216_p0)
}
  0xee   :  { %s241_s2 = smov 128   ;;  %s242_s27 = smov 8  }
  0xef   :  { %133 = dma.vmem_to_hbm [thread:$0]  %s128_s25, 256, %s278_s3, [#allocation4], %s241_s2, %s241_s2, %s242_s27  }
  0xf0   :  { %232 = dma.done.wait [#allocation4], 256  }
  0xf1   :  { %233 = vsyncadd [#allocation4], 4294967040 }
  0xf2   :  { %137 = vsyncpa [#allocation3], 1 }
  0xf3   :  { %138 = vsyncpa [#allocation6], 1 }
  0xf4   :  { %139 = vsyncpa [#allocation4], 1 }

</bundles_post_ra>
